<compile_context>
chip_gen: v6e
topology: v6e:2x2x1
jax: 0.10.0
libtpu: 0.0.40
codegen_flags: <defaults>
</compile_context>

<pallas_src>
import jax
import jax.numpy as jnp
from jax.experimental import pallas as pl
from jax.experimental.pallas import tpu as pltpu

_LANES = 128
# Per layer: (slab_row_start, padded_K_rows).  Row starts are 8-aligned and
# padded_K_rows are multiples of 8, so every kernel slice is a full sublane
# tile.  Shared by prepare_params() and _mlp_kernel().
#   layer 1 (B.fc1, 5->8):   rows  0:8   (K=5  padded to 8)
#   layer 2 (B.fc2, 8->10):  rows  8:16  (K=8)
#   layer 3 (A.fc1, 10->20): rows 16:32  (K=10 padded to 16)
#   layer 4 (A.fc2, 20->30): rows 32:56  (K=20 padded to 24)
_LAYER_ROWS = ((0, 8), (8, 8), (16, 16), (32, 24))
_W_SLAB_ROWS = 56
_OUT_F = 30


def _round_up(x, m):
    return ((x + m - 1) // m) * m


def _sigmoid(x):
    # sigmoid(x) == 0.5 * (tanh(x/2) + 1): a single EUP transcendental
    # instead of exp + divide.
    return 0.5 * (jnp.tanh(0.5 * x) + 1.0)


def _mlp_kernel(x_ref, w_ref, b_ref, o_ref):
    (r1, k1), (r2, k2), (r3, k3), (r4, k4) = _LAYER_ROWS

    x = x_ref[...]                                              # (tm, 5)
    tm = x.shape[0]
    # Pad the 5-wide input up to the 8-row K of the first weight tile
    # (lanes 5..7 are zero; the matching weight rows are zero too).
    x = jnp.concatenate([x, jnp.zeros((tm, 3), x.dtype)], axis=1)   # (tm, 8)

    b = b_ref[...]                                              # (8, 128)

    # All weight slices below are full (8k, 128) sublane tiles.  Intermediates
    # stay 128 lanes wide; unused lanes carry 0 (after ReLU) or 0.5 (after
    # sigmoid) and are annihilated by the next layer's zero-padded K rows.
    # Layer 1: B.fc1 + ReLU
    h = jnp.dot(x, w_ref[r1:r1 + k1, :], preferred_element_type=jnp.float32)
    h = jax.nn.relu(h + b[0:1, :])                              # (tm, 128)
    # Layer 2: B.fc2 + sigmoid
    h = jnp.dot(h[:, :k2], w_ref[r2:r2 + k2, :],
                preferred_element_type=jnp.float32)
    h = _sigmoid(h + b[1:2, :])
    # Layer 3: A.fc1 + ReLU
    h = jnp.dot(h[:, :k3], w_ref[r3:r3 + k3, :],
                preferred_element_type=jnp.float32)
    h = jax.nn.relu(h + b[2:3, :])
    # Layer 4: A.fc2 + sigmoid
    h = jnp.dot(h[:, :k4], w_ref[r4:r4 + k4, :],
                preferred_element_type=jnp.float32)
    h = _sigmoid(h + b[3:4, :])
    o_ref[...] = h[:, :_OUT_F]


def prepare_params(params):
    """One-time parameter prep (NOT in the hot path).

    Transposes torch-layout (out,in) weights to (in,out) and packs them into
    one zero-padded, fully tile-aligned (56,128) slab plus an (8,128) bias
    slab, so the kernel sees exactly two VMEM-resident param inputs and every
    in-kernel slice is a whole sublane tile.
    """
    ws = (params["sub_fc1_w"], params["sub_fc2_w"], params["fc1_w"], params["fc2_w"])
    bs = (params["sub_fc1_b"], params["sub_fc2_b"], params["fc1_b"], params["fc2_b"])

    wslab = jnp.zeros((_W_SLAB_ROWS, _LANES), jnp.float32)
    bslab = jnp.zeros((8, _LANES), jnp.float32)
    for i, ((row, kpad), w, b) in enumerate(zip(_LAYER_ROWS, ws, bs)):
        out_f, in_f = w.shape
        assert in_f <= kpad and out_f <= _LANES
        wslab = wslab.at[row:row + in_f, :out_f].set(w.T)
        bslab = bslab.at[i, :out_f].set(b)
    return wslab, bslab


def mlp_forward(x, wslab, bslab, *, tile_m=4096):
    """x: (batch, 5) float32. wslab/bslab: packed params from prepare_params."""
    batch = x.shape[0]

    # Row tile: multiple of 8, no bigger than needed, capped at 8192 so the
    # VMEM footprint (blocks + fused-body intermediates) stays inside v7x's
    # 64 MiB part as well as v5e/v6e.
    tile_m = max(8, min(_round_up(tile_m, 8), _round_up(batch, 8), 8192))
    padded = _round_up(batch, tile_m)
    if padded != batch:
        x = jnp.pad(x, ((0, padded - batch), (0, 0)))

    grid = (padded // tile_m,)

    # VMEM budget: in + out blocks each pad to 128 lanes (tile_m*512 B),
    # double-buffered (x4), plus ~5-6 live (tile_m,128) f32 intermediates in
    # the fused body, plus the ~64 KiB param slabs -> ~10 blocks + slack.
    block_bytes = tile_m * _LANES * 4
    vmem_limit = min(10 * block_bytes + (8 << 20), 56 << 20)

    flops = 2 * padded * (5 * 8 + 8 * 10 + 10 * 20 + 20 * 30)
    transcendentals = padded * (10 + 30)          # sigmoid tanh pushes
    bytes_accessed = 4 * (padded * 5 + wslab.size + bslab.size + padded * 30)

    out = pl.pallas_call(
        _mlp_kernel,
        out_shape=jax.ShapeDtypeStruct((padded, _OUT_F), jnp.float32),
        grid=grid,
        in_specs=[
            pl.BlockSpec((tile_m, 5), lambda i: (i, 0)),            # streamed
            pl.BlockSpec((_W_SLAB_ROWS, _LANES), lambda i: (0, 0)),  # resident
            pl.BlockSpec((8, _LANES), lambda i: (0, 0)),             # resident
        ],
        out_specs=pl.BlockSpec((tile_m, _OUT_F), lambda i: (i, 0)),
        compiler_params=pltpu.CompilerParams(
            dimension_semantics=("parallel",),        # 2-TC sharding on v7x
            vmem_limit_bytes=vmem_limit),
        cost_estimate=pl.CostEstimate(
            flops=flops,
            transcendentals=transcendentals,
            bytes_accessed=bytes_accessed),
    )(x, wslab, bslab)

    return out[:batch]


def _init_params(key):
    """Deterministic init matching nn.Linear shapes (torch-like fan-in uniform)."""
    def linear(key, out_f, in_f):
        kw, kb = jax.random.split(key)
        bound = 1.0 / jnp.sqrt(in_f)
        w = jax.random.uniform(kw, (out_f, in_f), jnp.float32, -bound, bound)
        b = jax.random.uniform(kb, (out_f,), jnp.float32, -bound, bound)
        return w, b

    k1, k2, k3, k4 = jax.random.split(key, 4)
    sub_fc1_w, sub_fc1_b = linear(k1, 8, 5)
    sub_fc2_w, sub_fc2_b = linear(k2, 10, 8)
    fc1_w, fc1_b = linear(k3, 20, 10)
    fc2_w, fc2_b = linear(k4, 30, 20)
    return dict(sub_fc1_w=sub_fc1_w, sub_fc1_b=sub_fc1_b,
                sub_fc2_w=sub_fc2_w, sub_fc2_b=sub_fc2_b,
                fc1_w=fc1_w, fc1_b=fc1_b,
                fc2_w=fc2_w, fc2_b=fc2_b)


def _reference(x, p):
    """Pure-JAX reference of the PyTorch forward."""
    h = jax.nn.relu(x @ p["sub_fc1_w"].T + p["sub_fc1_b"])
    h = jax.nn.sigmoid(h @ p["sub_fc2_w"].T + p["sub_fc2_b"])
    h = jax.nn.relu(h @ p["fc1_w"].T + p["fc1_b"])
    return jax.nn.sigmoid(h @ p["fc2_w"].T + p["fc2_b"])


if __name__ == "__main__":
    key = jax.random.PRNGKey(0)
    kx, kp = jax.random.split(key)

    batch = 30                                   # non-multiple of 8: exercises padding
    x = jax.random.normal(kx, (batch, 5), jnp.float32)
    params = _init_params(kp)
    wslab, bslab = prepare_params(params)        # one-time packing/transpose

    # Small tile here so the multi-step grid (+ VMEM-resident weights) is
    # actually exercised; production use keeps the default tile_m=4096.
    out = mlp_forward(x, wslab, bslab, tile_m=8)
    out = jax.block_until_ready(out)

    ref = _reference(x, params)
    assert out.shape == (batch, 30), out.shape
    assert jnp.allclose(out, ref, atol=1e-5, rtol=1e-5), "mismatch vs reference"

    print("KERNEL_OK")
</pallas_src>

<mosaic_0001>
module attributes {stable_mosaic.version = 11 : i64} {
  func.func @_mlp_kernel(%arg0: i32, %arg1: memref<8x5xf32, #tpu.memory_space<vmem>>, %arg2: memref<56x128xf32, #tpu.memory_space<vmem>>, %arg3: memref<8x128xf32, #tpu.memory_space<vmem>>, %arg4: memref<8x30xf32, #tpu.memory_space<vmem>>) attributes {dimension_semantics = [#tpu.dimension_semantics<parallel>], iteration_bounds = array<i64: 4>, scalar_prefetch = 0 : i64, scratch_operands = 0 : i64, tpu.core_type = #tpu.core_type<tc>, window_params = [{transform_indices = @transform_0, window_bounds = array<i64: 8, 5>}, {pipeline_mode = #tpu.pipeline_mode<synchronous>, transform_indices = @transform_1, window_bounds = array<i64: 56, 128>}, {pipeline_mode = #tpu.pipeline_mode<synchronous>, transform_indices = @transform_2, window_bounds = array<i64: 8, 128>}, {transform_indices = @transform_3, window_bounds = array<i64: 8, 30>}]} {
    %c0 = arith.constant 0 : index
    %c0_0 = arith.constant 0 : index
    %0 = vector.load %arg1[%c0, %c0_0] : memref<8x5xf32, #tpu.memory_space<vmem>>, vector<8x5xf32>
    %cst = arith.constant 0.000000e+00 : f32
    %1 = vector.broadcast %cst : f32 to vector<8x3xf32>
    %2 = tpu.concatenate %0, %1 in 1 : vector<8x5xf32>, vector<8x3xf32> -> vector<8x8xf32>
    %c0_1 = arith.constant 0 : index
    %c0_2 = arith.constant 0 : index
    %3 = vector.load %arg3[%c0_1, %c0_2] : memref<8x128xf32, #tpu.memory_space<vmem>>, vector<8x128xf32>
    %c0_3 = arith.constant 0 : index
    %c0_4 = arith.constant 0 : index
    %4 = vector.load %arg2[%c0_3, %c0_4] : memref<56x128xf32, #tpu.memory_space<vmem>>, vector<8x128xf32>
    %cst_5 = arith.constant dense<0.000000e+00> : vector<8x128xf32>
    %5 = tpu.matmul %2, %4, %cst_5 {dimension_numbers = #tpu.dot_dimension_numbers<[1], [0], [0], [1], [0, 0, 1, 1], [], []>} : vector<8x8xf32>, vector<8x128xf32>, vector<8x128xf32> -> vector<8x128xf32>
    %6 = vector.extract_strided_slice %3 {offsets = [0, 0], sizes = [1, 128], strides = [1, 1]} : vector<8x128xf32> to vector<1x128xf32>
    %7 = vector.broadcast %6 : vector<1x128xf32> to vector<8x128xf32>
    %8 = arith.addf %5, %7 : vector<8x128xf32>
    %cst_6 = arith.constant 0.000000e+00 : f32
    %9 = vector.broadcast %cst_6 : f32 to vector<8x128xf32>
    %10 = arith.maximumf %8, %9 : vector<8x128xf32>
    %11 = vector.extract_strided_slice %10 {offsets = [0, 0], sizes = [8, 8], strides = [1, 1]} : vector<8x128xf32> to vector<8x8xf32>
    %c8 = arith.constant 8 : index
    %c0_7 = arith.constant 0 : index
    %12 = vector.load %arg2[%c8, %c0_7] : memref<56x128xf32, #tpu.memory_space<vmem>>, vector<8x128xf32>
    %cst_8 = arith.constant dense<0.000000e+00> : vector<8x128xf32>
    %13 = tpu.matmul %11, %12, %cst_8 {dimension_numbers = #tpu.dot_dimension_numbers<[1], [0], [0], [1], [0, 0, 1, 1], [], []>} : vector<8x8xf32>, vector<8x128xf32>, vector<8x128xf32> -> vector<8x128xf32>
    %14 = vector.extract_strided_slice %3 {offsets = [1, 0], sizes = [1, 128], strides = [1, 1]} : vector<8x128xf32> to vector<1x128xf32>
    %15 = vector.broadcast %14 : vector<1x128xf32> to vector<8x128xf32>
    %16 = arith.addf %13, %15 : vector<8x128xf32>
    %cst_9 = arith.constant 5.000000e-01 : f32
    %17 = vector.broadcast %cst_9 : f32 to vector<8x128xf32>
    %18 = arith.mulf %17, %16 : vector<8x128xf32>
    %19 = math.tanh %18 : vector<8x128xf32>
    %cst_10 = arith.constant 1.000000e+00 : f32
    %20 = vector.broadcast %cst_10 : f32 to vector<8x128xf32>
    %21 = arith.addf %19, %20 : vector<8x128xf32>
    %cst_11 = arith.constant 5.000000e-01 : f32
    %22 = vector.broadcast %cst_11 : f32 to vector<8x128xf32>
    %23 = arith.mulf %22, %21 : vector<8x128xf32>
    %24 = vector.extract_strided_slice %23 {offsets = [0, 0], sizes = [8, 16], strides = [1, 1]} : vector<8x128xf32> to vector<8x16xf32>
    %c16 = arith.constant 16 : index
    %c0_12 = arith.constant 0 : index
    %25 = vector.load %arg2[%c16, %c0_12] : memref<56x128xf32, #tpu.memory_space<vmem>>, vector<16x128xf32>
    %cst_13 = arith.constant dense<0.000000e+00> : vector<8x128xf32>
    %26 = tpu.matmul %24, %25, %cst_13 {dimension_numbers = #tpu.dot_dimension_numbers<[1], [0], [0], [1], [0, 0, 1, 1], [], []>} : vector<8x16xf32>, vector<16x128xf32>, vector<8x128xf32> -> vector<8x128xf32>
    %27 = vector.extract_strided_slice %3 {offsets = [2, 0], sizes = [1, 128], strides = [1, 1]} : vector<8x128xf32> to vector<1x128xf32>
    %28 = vector.broadcast %27 : vector<1x128xf32> to vector<8x128xf32>
    %29 = arith.addf %26, %28 : vector<8x128xf32>
    %cst_14 = arith.constant 0.000000e+00 : f32
    %30 = vector.broadcast %cst_14 : f32 to vector<8x128xf32>
    %31 = arith.maximumf %29, %30 : vector<8x128xf32>
    %32 = vector.extract_strided_slice %31 {offsets = [0, 0], sizes = [8, 24], strides = [1, 1]} : vector<8x128xf32> to vector<8x24xf32>
    %c32 = arith.constant 32 : index
    %c0_15 = arith.constant 0 : index
    %33 = vector.load %arg2[%c32, %c0_15] : memref<56x128xf32, #tpu.memory_space<vmem>>, vector<24x128xf32>
    %cst_16 = arith.constant dense<0.000000e+00> : vector<8x128xf32>
    %34 = tpu.matmul %32, %33, %cst_16 {dimension_numbers = #tpu.dot_dimension_numbers<[1], [0], [0], [1], [0, 0, 1, 1], [], []>} : vector<8x24xf32>, vector<24x128xf32>, vector<8x128xf32> -> vector<8x128xf32>
    %35 = vector.extract_strided_slice %3 {offsets = [3, 0], sizes = [1, 128], strides = [1, 1]} : vector<8x128xf32> to vector<1x128xf32>
    %36 = vector.broadcast %35 : vector<1x128xf32> to vector<8x128xf32>
    %37 = arith.addf %34, %36 : vector<8x128xf32>
    %cst_17 = arith.constant 5.000000e-01 : f32
    %38 = vector.broadcast %cst_17 : f32 to vector<8x128xf32>
    %39 = arith.mulf %38, %37 : vector<8x128xf32>
    %40 = math.tanh %39 : vector<8x128xf32>
    %cst_18 = arith.constant 1.000000e+00 : f32
    %41 = vector.broadcast %cst_18 : f32 to vector<8x128xf32>
    %42 = arith.addf %40, %41 : vector<8x128xf32>
    %cst_19 = arith.constant 5.000000e-01 : f32
    %43 = vector.broadcast %cst_19 : f32 to vector<8x128xf32>
    %44 = arith.mulf %43, %42 : vector<8x128xf32>
    %45 = vector.extract_strided_slice %44 {offsets = [0, 0], sizes = [8, 30], strides = [1, 1]} : vector<8x128xf32> to vector<8x30xf32>
    %c0_20 = arith.constant 0 : index
    %c0_21 = arith.constant 0 : index
    %46 = vector.load %arg4[%c0_20, %c0_21] : memref<8x30xf32, #tpu.memory_space<vmem>>, vector<8x30xf32>
    tpu.vector_store %arg4[%c0_20, %c0_21], %45 {strides = array<i32>} : memref<8x30xf32, #tpu.memory_space<vmem>>, vector<8x30xf32>,
    return
  }
  func.func @transform_0(%arg0: i32) -> (i32, i32) {
    %c0_i32 = arith.constant 0 : i32
    %c0_i32_0 = arith.constant 0 : i32
    return %arg0, %c0_i32 : i32, i32
  }
  func.func @transform_1(%arg0: i32) -> (i32, i32) {
    %c0_i32 = arith.constant 0 : i32
    %c0_i32_0 = arith.constant 0 : i32
    %c0_i32_1 = arith.constant 0 : i32
    return %c0_i32, %c0_i32_0 : i32, i32
  }
  func.func @transform_2(%arg0: i32) -> (i32, i32) {
    %c0_i32 = arith.constant 0 : i32
    %c0_i32_0 = arith.constant 0 : i32
    %c0_i32_1 = arith.constant 0 : i32
    return %c0_i32, %c0_i32_0 : i32, i32
  }
  func.func @transform_3(%arg0: i32) -> (i32, i32) {
    %c0_i32 = arith.constant 0 : i32
    %c0_i32_0 = arith.constant 0 : i32
    return %arg0, %c0_i32 : i32, i32
  }
}

</mosaic_0001>

<bundles_post_ra>
// kernel: tpu_custom_call.1
= control target key start
LH: loop header
LB: loop body
LE: loop exit
PB: predicated region body
PF: predicated region fallthrough
CT: control target
= control target key end

     0   :  { %8 = vsyncpa [#allocation3], 0  ;;  %s943_s0 = inlined_call_operand.vmem [shape: f32[32,5], index: 0, kind: input, shape index: {}]   ;;  %s944_s1 = inlined_call_operand.hbm [shape: f32[56,128], index: 1, kind: input, shape index: {}]   ;;  %s945_s2 = inlined_call_operand.vmem [shape: f32[8,128], index: 2, kind: input, shape index: {}]   ;;  %s946_s3 = inlined_call_operand.hbm [shape: f32[32,30], index: 3, kind: output, shape index: {}]  }
   0x1   :  { %9 = vsyncpa [#allocation4], 0 }
   0x2   :  { %11 = vsyncpa [#allocation4 + $0x1], 0  ;;  %s829_s12 = smov 0   ;;  %s831_s13 = smov 0  }
   0x3   :  { %s833_s14 = smov 0   ;;  %s835_s15 = smov 0  }
   0x4 LB: > { %s850_s16 = sadd.s32 4294967295, %s801_s15   ;;  %s600_s17 = sadd.s32 4294967294, %s801_s15   ;;  %s801_s15 = sphi %s835_s15, %s954_s15   ;;  %s797_s14 = sphi %s833_s14, %s953_s14   ;;  %s793_s13 = sphi %s831_s13, %s952_s13   ;;  %s789_s12 = sphi %s829_s12, %s951_s12  }
   0x5   : > { %s854_s18 = sadd.s32 1, %s801_s15   ;;  %s92_s19 = sadd.s32 1, %s797_s14 }
   0x6   : > { %s89_s20 = ssub.s32 %s801_s15, %s854_s18  ;;  %p102_p0 = scmp.ne.s32.totalorder %s797_s14, %s793_s13 }
   0x7   : > { %p90_p1 = scmp.eq.s32.totalorder %s89_s20, 0  ;;  %p103_p2 = scmp.eq.s32.totalorder %s850_s16, 3 }
   0x8   : > { %p108_p3 = scmp.ne.s32.totalorder %s793_s13, %s789_s12  ;;  %p109_p4 = scmp.eq.s32.totalorder %s600_s17, 3 }
   0x9   : > { %s865_s21 = scalar_select %p90_p1, %s797_s14, %s92_s19  }
   0xa   : > { %p867_p5 = por %p103_p2, %p102_p0  ;;  %p871_p6 = por %p109_p4, %p108_p3 }
   0xb   : > { %p601_p7 = scmp.ge.s32.totalorder %s801_s15, 1  ;;  %p116_p8 = scmp.lt.s32.totalorder %s801_s15, 5 }
   0xc   : > { %s948_s23 = scalar_select %p871_p6, 1, 0 }
   0xd   : > { %p667_p9 = scmp.eq.s32.totalorder %s850_s16, 0  ;;  %p878_p10 = pnand %p601_p7, %p116_p8 }
   0xe   : > { %s803_s25 = smov [#allocation2]  }
   0xf   : > { %s128_s26 = sshll.u32 %s803_s25, 4  ;;  %p659_p11 = pneg %p878_p10  ;;  %s129_s26 = int_to_ptr.vmem [resolvable:$true] %s128_s26 }
  0x10   : > { %s722_s27 = scalar_lea.vmem %s129_s26, 896  ;;  %p730_p3 = scmp.lt.s32.totalorder %s129_s26, %s129_s26 }
  0x11   : > { %p660_p12 = pnand %p667_p9, %p659_p11  ;;  %p723_p0 = scmp.ne.s32.totalorder %s129_s26, %s722_s27 }
  0x12   : > { %p731_p4 = scmp.lt.s32.totalorder %s722_s27, %s722_s27 }
  0x13   : > { %p713_p13 = pneg %p660_p12 }
  0x14   : > { %p732_p6 = por %p731_p4, %p730_p3 }
  0x15   : > { %p725_p1 = pnand %p723_p0, %p713_p13 }
  0x17   : > { %p726_p2 = pneg %p725_p1 }
  0x19   : > { %p733_p7 = pnand %p732_p6, %p726_p2 }
  0x1b   : > { %736 = shalt.err (!%p733_p7)
}
  0x1c   : > { %s804_s28 = smov 128   ;;  %s805_s29 = smov 8  }
  0x1d   : > { %662 = dma.hbm_to_vmem [thread:$0]  (!%p660_p12), %s944_s1, 896, %s129_s26, [#allocation3], %s804_s28, %s804_s28, %s805_s29  }
  0x1e   : > { %154 = sbr.rel (%p878_p10) target bundleno = 881 (0x371), region = 32 }
  0x23   : > { %780 = dma.done.wait (%p667_p9), [#allocation3], 896  }
  0x24   : > { %782 = vsyncadd (%p667_p9), [#allocation3], 4294966400  ;;  %p177_p8 = scmp.lt.s32.totalorder %s850_s16, 3  ;;  %v806_v0 = vmov 0.0   ;;  %vm807_vm0 = vmmov 0   ;;  %vm182_vm1 = vcmask 39936   ;;  %v186_v5 = vlaneseq }
  0x25   : > { %627 = vmatprep.subr.mxu0 %v806_v0  ;;  %629 = vmatprep.mubr.msk.f32.mxu0 %vm807_vm0, %v806_v0  ;;  %vm190_vm2 = vcmask 64512   ;;  %v185_v1 = vld [vmem:[#allocation2] sm:$0xff]  ;;  %v265_v4 = vld [vmem:[#allocation2 + $0x8] sm:$0xff]  ;;  %v348_v14 = vld [vmem:[#allocation2 + $0x18] sm:$0xff]  ;;  %vm353_vm3 = vcmask 130048   ;;  %vm435_vm4 = vcmask 195584  }
  0x26   : > { %s178_s5 = scalar_select %p177_p8, %s850_s16, 3  ;;  %632 = vmatprep.subr.mxu1 %v806_v0  ;;  %634 = vmatprep.mubr.msk.f32.mxu1 %vm807_vm0, %v806_v0  ;;  %v187_v6 = vshrl.u32 %v186_v5, 7  ;;  %v184_v8 = vld [vmem:[%s945_s2] sm:$0xff]  ;;  %v347_v15 = vld [vmem:[#allocation2 + $0x10] sm:$0xff]  ;;  %v429_v26 = vld [vmem:[#allocation2 + $0x28] sm:$0xff]  ;;  %vm513_vm5 = vcmask 244736  }
  0x27   : > { %628 = vmatpush3.msra.mxu0 %v185_v1  ;;  %633 = vmatpush3.msra.mxu1 %v265_v4  ;;  %v430_v25 = vld [vmem:[#allocation2 + $0x30] sm:$0xff]  ;;  %v428_v27 = vld [vmem:[#allocation2 + $0x20] sm:$0xff]  ;;  %s174_s17 = sand.u32 1, %s793_s13   ;;  %s613_s20 = sshll.u32 %s850_s16, 7 }
  0x28   : > { %s607_s6 = sshll.u32 %s178_s5, 3  ;;  %637 = vmatprep.subr.mxu0 %v806_v0  ;;  %644 = vmatprep.subr.mxu1 %v806_v0  ;;  %v188_v7 = vsub.s32 0, %v187_v6  ;;  %v268_v16 = vsub.s32 1, %v187_v6  ;;  %v351_v28 = vsub.s32 2, %v187_v6  ;;  %v433_v34 = vsub.s32 3, %v187_v6  ;;  %s606_s19 = sshll.u32 %s174_s17, 3 }
  0x29   : > { %s180_s9 = scalar_lea.vmem %s943_s0, %s607_s6  ;;  %s176_s24 = scalar_lea.vmem [#allocation5], %s606_s19 }
  0x2a   : > { %v181_v2 = vld [vmem:[%s180_s9] sm:$0xff]  ;;  %v189_v9 = vrot.slane %v184_v8, %v188_v7  ;;  %v269_v17 = vrot.slane %v184_v8, %v268_v16  ;;  %v352_v29 = vrot.slane %v184_v8, %v351_v28  ;;  %v434_v35 = vrot.slane %v184_v8, %v433_v34  ;;  %s529_s25 = sshll.u32 %s176_s24, 4  ;;  %s527_s28 = scalar_lea.hbm %s946_s3, %s613_s20  ;;  %s530_s25 = int_to_ptr.vmem [resolvable:$true] %s529_s25 }
  0x2b   : > { %v183_v3 = vsel %vm182_vm1, %v181_v2, 0.0  ;;  %s516_s29 = scalar_lea.sflag [#allocation4], %s174_s17  ;;  %s737_s30 = scalar_lea.vmem %s530_s25, 128 }
  0x2c   : > { %630 = vmatmul.mubr.msk.f32.vlgmr.msra.gmra.mxu0 %vm190_vm2, %v183_v3  ;;  %p738_p6 = scmp.ne.s32.totalorder %s530_s25, %s737_s30  ;;  %s808_s4 = smov [#allocation5]  }
  0x2d   : > { %641 = vmatprep.mubr.msk.f32.mxu0 %vm807_vm0, %v806_v0  ;;  %638 = vmatpush3.msra.mxu0 %v348_v14  ;;  %s741_s5 = sshll.u32 %s808_s4, 4  ;;  %s742_s5 = int_to_ptr.vmem [resolvable:$false] %s741_s5 }
  0x2e   : > { %639 = vmatprep.subr.mxu0 %v806_v0  ;;  %p739_p9 = pnand %p738_p6, %p867_p5  ;;  %s743_s16 = scalar_lea.vmem %s742_s5, 256 }
  0x2f   : > { %640 = vmatpush3.msra.mxu0 %v347_v15  ;;  %p744_p11 = scmp.lt.s32.totalorder %s530_s25, %s742_s5  ;;  %p745_p12 = scmp.lt.s32.totalorder %s743_s16, %s737_s30 }
  0x30   : > { %p740_p10 = pneg %p739_p9 }
  0x31   : > { %p746_p13 = por %p745_p12, %p744_p11 }
  0x33   : > { %p747_p0 = pnand %p746_p13, %p740_p10 }
  0xec   : > { %v260_v10 = vpop.f32.mrf.mxu0 }
  0xed   : > { %v261_v11 = vadd.f32 %v260_v10, %v189_v9 }
  0xee   : > { %v631_v12 = vpop.f32.mrf.mxu0 }
  0xef   : > { %v264_v13 = vmax.f32 %v261_v11, 0.0 }
  0xf1   : > { %635 = vmatmul.mubr.msk.f32.vlgmr.msra.gmra.mxu1 %vm190_vm2, %v264_v13 }
  0xf2   : > { %650 = vmatprep.mubr.msk.f32.mxu1 %vm807_vm0, %v806_v0  ;;  %645 = vmatpush3.msra.mxu1 %v430_v25 }
  0xf3   : > { %646 = vmatprep.subr.mxu1 %v806_v0 }
  0xf4   : > { %647 = vmatpush3.msra.mxu1 %v429_v26 }
  0xf5   : > { %648 = vmatprep.subr.mxu1 %v806_v0 }
  0xf6   : > { %649 = vmatpush3.msra.mxu1 %v428_v27 }
 0x1b1   : > { %v339_v18 = vpop.f32.mrf.mxu1 }
 0x1b2   : > { %v340_v19 = vadd.f32 %v339_v18, %v269_v17 }
 0x1b3   : > { %v636_v20 = vpop.f32.mrf.mxu1 }
 0x1b4   : > { %v343_v21 = vmul.f32 0.5, %v340_v19 }
 0x1b6   : > { %707 = vtanh.f32 %v343_v21 }
 0x1c3   : > { %v708_v22 = vpop.eup %707 }
 0x1c4   : > { %v345_v23 = vadd.f32 1.0, %v708_v22 }
 0x1c6   : > { %v346_v24 = vmul.f32 0.5, %v345_v23 }
 0x1c8   : > { %642 = vmatmul.mubr.msk.f32.vlgmr.msra.gmra.mxu0 %vm353_vm3, %v346_v24 }
 0x288   : > { %v423_v30 = vpop.f32.mrf.mxu0 }
 0x289   : > { %v424_v31 = vadd.f32 %v423_v30, %v352_v29 }
 0x28a   : > { %v643_v32 = vpop.f32.mrf.mxu0 }
 0x28b   : > { %v427_v33 = vmax.f32 %v424_v31, 0.0 }
 0x28d   : > { %651 = vmatmul.mubr.msk.f32.vlgmr.msra.gmra.mxu1 %vm435_vm4, %v427_v33 }
 0x34d   : > { %v505_v36 = vpop.f32.mrf.mxu1 }
 0x34e   : > { %v506_v37 = vadd.f32 %v505_v36, %v434_v35 }
 0x34f   : > { %v652_v38 = vpop.f32.mrf.mxu1 }
 0x350   : > { %v509_v39 = vmul.f32 0.5, %v506_v37 }
 0x352   : > { %709 = vtanh.f32 %v509_v39 }
 0x35f   : > { %v710_v40 = vpop.eup %709 }
 0x360   : > { %v511_v41 = vadd.f32 1.0, %v710_v40 }
 0x362   : > { %v512_v42 = vmul.f32 0.5, %v511_v41 }
 0x364   : > { %514 = vst.msk [vmem:[%s176_s24] sm:$0xff] %vm513_vm5, %v512_v42 }
 0x365   : > { %750 = shalt.err (!%p747_p0)
}
 0x366   : > { %s751_s6 = scalar_lea.hbm %s527_s28, 128  ;;  %s755_s9 = scalar_lea.hbm %s946_s3, 512 }
 0x367   : > { %p752_p1 = scmp.ne.s32.totalorder %s527_s28, %s751_s6  ;;  %p756_p4 = scmp.lt.s32.totalorder %s527_s28, %s946_s3 }
 0x368   : > { %p757_p7 = scmp.lt.s32.totalorder %s755_s9, %s751_s6 }
 0x369   : > { %p753_p2 = pnand %p752_p1, %p867_p5 }
 0x36a   : > { %p758_p8 = por %p757_p7, %p756_p4 }
 0x36b   : > { %p754_p3 = pneg %p753_p2 }
 0x36d   : > { %p759_p6 = pnand %p758_p8, %p754_p3 }
 0x36f   : > { %762 = shalt.err (!%p759_p6)
}
 0x370   : > { %657 = dma.vmem_to_hbm [thread:$0]  (%p867_p5), %s530_s25, 128, %s527_s28, %s516_s29  }
 0x371 PF: > { %p669_p9 = scmp.ge.s32.totalorder %s801_s15, 2  ;;  %s541_s17 = sand.u32 1, %s789_s12  }
 0x372   : > { %p950_p10 = scmp.ne.s32.totalorder %s948_s23, 0  ;;  %s542_s19 = scalar_lea.sflag [#allocation4], %s541_s17 }
 0x374   : > { %p664_p11 = pnand %p669_p9, %p950_p10 }
 0x376   : > { %p665_p12 = pneg %p664_p11 }
 0x378   : > { %784 = dma.done.wait (%p665_p12), %s542_s19, 128  }
 0x379   : > { %786 = vsyncadd (%p665_p12), %s542_s19, 4294967168  ;;  %p14_p13 = scmp.ge.s32.totalorder %s854_s18, 6   ;;  %s951_s12 = smov %s793_s13 }
 0x37a   : > { %s952_s13 = smov %s797_s14  ;;  %s953_s14 = smov %s865_s21 }
 0x37b   : > { %s954_s15 = smov %s854_s18  ;;  %16 = sbr.rel (!%p14_p13) target bundleno = 4 (0x4), region = 72 }
 0x380   :  { %547 = vsyncpa [#allocation3], 1 }
 0x381   :  { %549 = vsyncpa [#allocation3 + $0x1], 1 }
 0x382   :  { %550 = vsyncpa [#allocation4], 1 }
 0x383   :  { %552 = vsyncpa [#allocation4 + $0x1], 1 }

</bundles_post_ra>
